<compile_context>
chip_gen: v7x
topology: tpu7x:2x2x1
jax: 0.10.0
libtpu: 0.0.40
codegen_flags: <defaults>
</compile_context>

<pallas_src>
import math

import jax
import jax.numpy as jnp
from jax.experimental import pallas as pl
from jax.experimental.pallas import tpu as pltpu


def _round_up(n: int, m: int) -> int:
    return ((n + m - 1) // m) * m


def _discriminator_kernel(x_ref, w1_ref, b1_ref, w2_ref, b2_ref, w3_ref, b3_ref, o_ref):
    """Fused 3-layer MLP forward on one batch tile.

    x_ref : (TB, D)    compute dtype (f32 / bf16 / fp8)
    w1    : (D, Hp)    compute dtype    b1: (1, Hp) f32
    w2    : (Hp, Hp)   compute dtype    b2: (1, Hp) f32
    w3    : (1, Hp)    compute dtype (row vector)
    b3    : (1, 1)     f32 scalar in SMEM
    o_ref : (1, 1, TB) lane-dense output row
    """
    w_dtype = w1_ref.dtype
    x = x_ref[...]                                                  # (tb, D)

    # lin1 + ReLU (f32 accumulate, f32 bias add)
    h1 = jnp.dot(x, w1_ref[...], preferred_element_type=jnp.float32)
    h1 = jnp.maximum(h1 + b1_ref[...], 0.0)                         # (tb, Hp) f32

    # lin2 + ReLU
    h2 = jnp.dot(h1.astype(w_dtype), w2_ref[...],
                 preferred_element_type=jnp.float32)
    h2 = jnp.maximum(h2 + b2_ref[...], 0.0)                         # (tb, Hp) f32

    # lin3: out[b] = sum_h h2[b, h] * w3[h] + b3, computed as a
    # (1, Hp) x (tb, Hp)^T contraction so the result is lane-dense (1, tb).
    out_row = jax.lax.dot_general(
        w3_ref[...], h2.astype(w_dtype),
        dimension_numbers=(((1,), (1,)), ((), ())),
        preferred_element_type=jnp.float32)                         # (1, tb)
    out_row = out_row + b3_ref[0, 0]

    o_ref[...] = out_row[None].astype(o_ref.dtype)                  # (1, 1, tb)


def discriminator_forward(x, params, *, batch_tile=None, compute_dtype=None):
    """Run the fused Discriminator MLP with a Pallas TPU kernel.

    x      : (B, z_dim)
    params : dict with w1 (D,H), b1 (H,), w2 (H,H), b2 (H,), w3 (H,1), b3 (1,)
    compute_dtype : None -> use x.dtype (exact PyTorch semantics for f32 x).
                    Pass jnp.bfloat16 (or jnp.float8_e4m3fn on v7x) as an
                    explicit opt-in to halve the HBM-bound x stream.
    """
    B, D = x.shape
    H = params["w1"].shape[1]
    out_dtype = x.dtype
    if compute_dtype is None:
        compute_dtype = x.dtype
    itemsize = jnp.dtype(compute_dtype).itemsize

    # ---- Batch tile selection (always a multiple of 128 lanes) ----
    if batch_tile is not None:
        tb = _round_up(max(int(batch_tile), 1), 128)
    elif B <= 2048:
        tb = _round_up(B, 128)                        # single grid step
    else:
        # target ~1 MiB of x per grid step, clamped to [1024, 4096] rows
        target_rows = (1 << 20) // max(D * itemsize, 1)
        tb = _round_up(min(max(target_rows, 1024), 4096), 128)
    tb = min(tb, _round_up(B, 128))
    num_tiles = pl.cdiv(B, tb)

    # ---- Hidden-dim lane padding (exact zeros -> identical math) ----
    Hp = _round_up(H, 128)

    def _pad_cols(a, cols):
        if a.shape[-1] == cols:
            return a
        pad = [(0, 0)] * (a.ndim - 1) + [(0, cols - a.shape[-1])]
        return jnp.pad(a, pad)

    x_c = x if x.dtype == compute_dtype else x.astype(compute_dtype)
    w1 = _pad_cols(params["w1"].astype(compute_dtype), Hp)               # (D, Hp)
    w2 = params["w2"].astype(compute_dtype)
    if Hp != H:
        w2 = jnp.pad(w2, ((0, Hp - H), (0, Hp - H)))                     # (Hp, Hp)
    w3 = _pad_cols(params["w3"].reshape(1, H).astype(compute_dtype), Hp) # (1, Hp)
    b1 = _pad_cols(params["b1"].reshape(1, H).astype(jnp.float32), Hp)   # (1, Hp)
    b2 = _pad_cols(params["b2"].reshape(1, H).astype(jnp.float32), Hp)   # (1, Hp)
    b3 = params["b3"].reshape(1, 1).astype(jnp.float32)                  # SMEM scalar

    flops = 2 * B * (D * Hp + Hp * Hp + Hp)
    bytes_accessed = (
        B * D * itemsize                                                  # x stream (no pad copy)
        + (D * Hp + Hp * Hp + Hp) * itemsize                              # weights
        + (2 * Hp + 1) * 4                                                # biases (f32)
        + num_tiles * tb * jnp.dtype(out_dtype).itemsize                  # output
    )

    out = pl.pallas_call(
        _discriminator_kernel,
        out_shape=jax.ShapeDtypeStruct((num_tiles, 1, tb), out_dtype),
        grid_spec=pltpu.PrefetchScalarGridSpec(
            num_scalar_prefetch=0,
            grid=(num_tiles,),
            in_specs=[
                pl.BlockSpec((tb, D), lambda i: (i, 0)),           # x tile (tail clipped)
                pl.BlockSpec((D, Hp), lambda i: (0, 0)),           # w1 (resident)
                pl.BlockSpec((1, Hp), lambda i: (0, 0)),           # b1
                pl.BlockSpec((Hp, Hp), lambda i: (0, 0)),          # w2
                pl.BlockSpec((1, Hp), lambda i: (0, 0)),           # b2
                pl.BlockSpec((1, Hp), lambda i: (0, 0)),           # w3 (row)
                pl.BlockSpec(memory_space=pltpu.MemorySpace.SMEM), # b3 scalar
            ],
            out_specs=pl.BlockSpec((1, 1, tb), lambda i: (i, 0, 0)),
        ),
        compiler_params=pltpu.CompilerParams(
            dimension_semantics=("parallel",),
        ),
        cost_estimate=pl.CostEstimate(
            flops=flops, transcendentals=0, bytes_accessed=bytes_accessed),
    )(x_c, w1, b1, w2, b2, w3, b3)

    # (num_tiles, 1, tb) -> (num_tiles*tb, 1) -> (B, 1); garbage tail rows dropped.
    return out.reshape(num_tiles * tb, 1)[:B]


def init_discriminator_params(key, z_dim, dtype=jnp.float32):
    """Deterministic init matching nn.Linear default: U(-1/sqrt(fan_in), 1/sqrt(fan_in)).

    Weights are stored transposed relative to PyTorch: shape (in, out).
    """
    hidden = 2 * z_dim
    keys = jax.random.split(key, 6)

    def uni(k, shape, fan_in):
        bound = 1.0 / math.sqrt(fan_in)
        return jax.random.uniform(k, shape, dtype=dtype, minval=-bound, maxval=bound)

    return {
        "w1": uni(keys[0], (z_dim, hidden), z_dim),
        "b1": uni(keys[1], (hidden,), z_dim),
        "w2": uni(keys[2], (hidden, hidden), hidden),
        "b2": uni(keys[3], (hidden,), hidden),
        "w3": uni(keys[4], (hidden, 1), hidden),
        "b3": uni(keys[5], (1,), hidden),
    }


def discriminator_reference(x, params):
    """Plain-JAX f32 reference of the PyTorch forward, for verification."""
    h = jnp.maximum(x @ params["w1"] + params["b1"], 0.0)
    h = jnp.maximum(h @ params["w2"] + params["b2"], 0.0)
    return h @ params["w3"] + params["b3"]


if __name__ == "__main__":
    key = jax.random.PRNGKey(0)
    k_param, k_x1, k_x2, k_x3 = jax.random.split(key, 4)

    Z = 32                                   # z_dim=32 -> hidden=64 (padded to 128 lanes)
    params = init_discriminator_params(k_param, Z)

    # Test 1: tiny batch, f32 (default = input dtype), single grid step.
    B1 = 8
    x1 = jax.random.normal(k_x1, (B1, Z), dtype=jnp.float32)
    out1 = jax.block_until_ready(discriminator_forward(x1, params))
    ref1 = discriminator_reference(x1, params)
    assert out1.shape == (B1, 1), out1.shape
    assert jnp.allclose(out1, ref1, atol=1e-4, rtol=1e-4), "f32 single-tile mismatch"

    # Test 2: ragged batch over a multi-tile grid with a partial tail tile, f32.
    B2 = 300                                 # 3 tiles of 128, last tile partial
    x2 = jax.random.normal(k_x2, (B2, Z), dtype=jnp.float32)
    out2 = jax.block_until_ready(
        discriminator_forward(x2, params, batch_tile=128))
    ref2 = discriminator_reference(x2, params)
    assert out2.shape == (B2, 1), out2.shape
    assert jnp.allclose(out2, ref2, atol=1e-4, rtol=1e-4), "f32 multi-tile mismatch"

    # Test 3: explicit opt-in bf16 compute (halves the HBM x stream), loose tol.
    B3 = 50
    x3 = jax.random.normal(k_x3, (B3, Z), dtype=jnp.float32)
    out3 = jax.block_until_ready(
        discriminator_forward(x3, params, compute_dtype=jnp.bfloat16))
    ref3 = discriminator_reference(x3, params)
    assert out3.shape == (B3, 1), out3.shape
    assert jnp.allclose(out3, ref3, atol=5e-2, rtol=5e-2), "bf16 mismatch vs reference"

    print("KERNEL_OK")
</pallas_src>

<mosaic_0001>
module attributes {stable_mosaic.version = 11 : i64} {
  func.func @_discriminator_kernel(%arg0: i32, %arg1: memref<128x32xf32, #tpu.memory_space<vmem>>, %arg2: memref<32x128xf32, #tpu.memory_space<vmem>>, %arg3: memref<1x128xf32, #tpu.memory_space<vmem>>, %arg4: memref<128x128xf32, #tpu.memory_space<vmem>>, %arg5: memref<1x128xf32, #tpu.memory_space<vmem>>, %arg6: memref<1x128xf32, #tpu.memory_space<vmem>>, %arg7: memref<1x1xf32, #tpu.memory_space<smem>>, %arg8: memref<1x1x128xf32, #tpu.memory_space<vmem>>) attributes {dimension_semantics = [#tpu.dimension_semantics<parallel>], iteration_bounds = array<i64: 1>, scalar_prefetch = 0 : i64, scratch_operands = 0 : i64, tpu.core_type = #tpu.core_type<tc>, window_params = [{transform_indices = @transform_0, window_bounds = array<i64: 128, 32>}, {pipeline_mode = #tpu.pipeline_mode<synchronous>, transform_indices = @transform_1, window_bounds = array<i64: 32, 128>}, {pipeline_mode = #tpu.pipeline_mode<synchronous>, transform_indices = @transform_2, window_bounds = array<i64: 1, 128>}, {pipeline_mode = #tpu.pipeline_mode<synchronous>, transform_indices = @transform_3, window_bounds = array<i64: 128, 128>}, {pipeline_mode = #tpu.pipeline_mode<synchronous>, transform_indices = @transform_4, window_bounds = array<i64: 1, 128>}, {pipeline_mode = #tpu.pipeline_mode<synchronous>, transform_indices = @transform_5, window_bounds = array<i64: 1, 128>}, {transform_indices = @transform_6, window_bounds = array<i64: 1, 1>}, {transform_indices = @transform_7, window_bounds = array<i64: 1, 1, 128>}]} {
    %c0 = arith.constant 0 : index
    %c0_0 = arith.constant 0 : index
    %0 = vector.load %arg1[%c0, %c0_0] : memref<128x32xf32, #tpu.memory_space<vmem>>, vector<128x32xf32>
    %c0_1 = arith.constant 0 : index
    %c0_2 = arith.constant 0 : index
    %1 = vector.load %arg2[%c0_1, %c0_2] : memref<32x128xf32, #tpu.memory_space<vmem>>, vector<32x128xf32>
    %cst = arith.constant dense<0.000000e+00> : vector<128x128xf32>
    %2 = tpu.matmul %0, %1, %cst {dimension_numbers = #tpu.dot_dimension_numbers<[1], [0], [0], [1], [0, 0, 1, 1], [], []>} : vector<128x32xf32>, vector<32x128xf32>, vector<128x128xf32> -> vector<128x128xf32>
    %c0_3 = arith.constant 0 : index
    %c0_4 = arith.constant 0 : index
    %3 = vector.load %arg3[%c0_3, %c0_4] : memref<1x128xf32, #tpu.memory_space<vmem>>, vector<1x128xf32>
    %4 = vector.broadcast %3 : vector<1x128xf32> to vector<128x128xf32>
    %5 = arith.addf %2, %4 : vector<128x128xf32>
    %cst_5 = arith.constant 0.000000e+00 : f32
    %6 = vector.broadcast %cst_5 : f32 to vector<128x128xf32>
    %7 = arith.maximumf %5, %6 : vector<128x128xf32>
    %c0_6 = arith.constant 0 : index
    %c0_7 = arith.constant 0 : index
    %8 = vector.load %arg4[%c0_6, %c0_7] : memref<128x128xf32, #tpu.memory_space<vmem>>, vector<128x128xf32>
    %cst_8 = arith.constant dense<0.000000e+00> : vector<128x128xf32>
    %9 = tpu.matmul %7, %8, %cst_8 {dimension_numbers = #tpu.dot_dimension_numbers<[1], [0], [0], [1], [0, 0, 1, 1], [], []>} : vector<128x128xf32>, vector<128x128xf32>, vector<128x128xf32> -> vector<128x128xf32>
    %c0_9 = arith.constant 0 : index
    %c0_10 = arith.constant 0 : index
    %10 = vector.load %arg5[%c0_9, %c0_10] : memref<1x128xf32, #tpu.memory_space<vmem>>, vector<1x128xf32>
    %11 = vector.broadcast %10 : vector<1x128xf32> to vector<128x128xf32>
    %12 = arith.addf %9, %11 : vector<128x128xf32>
    %cst_11 = arith.constant 0.000000e+00 : f32
    %13 = vector.broadcast %cst_11 : f32 to vector<128x128xf32>
    %14 = arith.maximumf %12, %13 : vector<128x128xf32>
    %c0_12 = arith.constant 0 : index
    %c0_13 = arith.constant 0 : index
    %15 = vector.load %arg6[%c0_12, %c0_13] : memref<1x128xf32, #tpu.memory_space<vmem>>, vector<1x128xf32>
    %cst_14 = arith.constant dense<0.000000e+00> : vector<1x128xf32>
    %16 = tpu.matmul %15, %14, %cst_14 {dimension_numbers = #tpu.dot_dimension_numbers<[1], [1], [0], [0], [0, 0, 1, 0], [], []>} : vector<1x128xf32>, vector<128x128xf32>, vector<1x128xf32> -> vector<1x128xf32>
    %c0_15 = arith.constant 0 : index
    %c0_16 = arith.constant 0 : index
    %17 = memref.load %arg7[%c0_15, %c0_16] : memref<1x1xf32, #tpu.memory_space<smem>>
    %18 = vector.broadcast %17 : f32 to vector<1x128xf32>
    %19 = arith.addf %16, %18 : vector<1x128xf32>
    %20 = vector.shape_cast %19 : vector<1x128xf32> to vector<1x1x128xf32>
    %c0_17 = arith.constant 0 : index
    %c0_18 = arith.constant 0 : index
    %c0_19 = arith.constant 0 : index
    %21 = vector.load %arg8[%c0_17, %c0_18, %c0_19] : memref<1x1x128xf32, #tpu.memory_space<vmem>>, vector<1x1x128xf32>
    tpu.vector_store %arg8[%c0_17, %c0_18, %c0_19], %20 {strides = array<i32>} : memref<1x1x128xf32, #tpu.memory_space<vmem>>, vector<1x1x128xf32>,
    return
  }
  func.func @transform_0(%arg0: i32) -> (i32, i32) {
    %c0_i32 = arith.constant 0 : i32
    %c0_i32_0 = arith.constant 0 : i32
    return %arg0, %c0_i32 : i32, i32
  }
  func.func @transform_1(%arg0: i32) -> (i32, i32) {
    %c0_i32 = arith.constant 0 : i32
    %c0_i32_0 = arith.constant 0 : i32
    %c0_i32_1 = arith.constant 0 : i32
    return %c0_i32, %c0_i32_0 : i32, i32
  }
  func.func @transform_2(%arg0: i32) -> (i32, i32) {
    %c0_i32 = arith.constant 0 : i32
    %c0_i32_0 = arith.constant 0 : i32
    %c0_i32_1 = arith.constant 0 : i32
    return %c0_i32, %c0_i32_0 : i32, i32
  }
  func.func @transform_3(%arg0: i32) -> (i32, i32) {
    %c0_i32 = arith.constant 0 : i32
    %c0_i32_0 = arith.constant 0 : i32
    %c0_i32_1 = arith.constant 0 : i32
    return %c0_i32, %c0_i32_0 : i32, i32
  }
  func.func @transform_4(%arg0: i32) -> (i32, i32) {
    %c0_i32 = arith.constant 0 : i32
    %c0_i32_0 = arith.constant 0 : i32
    %c0_i32_1 = arith.constant 0 : i32
    return %c0_i32, %c0_i32_0 : i32, i32
  }
  func.func @transform_5(%arg0: i32) -> (i32, i32) {
    %c0_i32 = arith.constant 0 : i32
    %c0_i32_0 = arith.constant 0 : i32
    %c0_i32_1 = arith.constant 0 : i32
    return %c0_i32, %c0_i32_0 : i32, i32
  }
  func.func @transform_6(%arg0: i32) -> (i32, i32) {
    %c0_i32 = arith.constant 0 : i32
    %c0_i32_0 = arith.constant 0 : i32
    %c0_i32_1 = arith.constant 0 : i32
    return %c0_i32, %c0_i32_0 : i32, i32
  }
  func.func @transform_7(%arg0: i32) -> (i32, i32, i32) {
    %c0_i32 = arith.constant 0 : i32
    %c0_i32_0 = arith.constant 0 : i32
    %c0_i32_1 = arith.constant 0 : i32
    return %arg0, %c0_i32, %c0_i32_0 : i32, i32, i32
  }
}

</mosaic_0001>

<bundles_post_ra>
// kernel: tpu_custom_call.1
= control target key start
LH: loop header
LB: loop body
LE: loop exit
PB: predicated region body
PF: predicated region fallthrough
CT: control target
= control target key end

     0   :  { %13 = vsyncpa [#allocation4], 0  ;;  %s1107_s0 = inlined_call_operand.hbm [shape: f32[8,32], index: 0, kind: input, shape index: {}]   ;;  %s1108_s1 = inlined_call_operand.hbm [shape: f32[32,128], index: 1, kind: input, shape index: {}]   ;;  %s1109_s2 = inlined_call_operand.vmem [shape: f32[1,128], index: 2, kind: input, shape index: {}]   ;;  %s1110_s3 = inlined_call_operand.hbm [shape: f32[128,128], index: 3, kind: input, shape index: {}]   ;;  %s1111_s4 = inlined_call_operand.vmem [shape: f32[1,128], index: 4, kind: input, shape index: {}]   ;;  %s1112_s5 = inlined_call_operand.vmem [shape: f32[1,128], index: 5, kind: input, shape index: {}]   ;;  %s1113_s6 = inlined_call_operand.<no memory space> [shape: f32[1,1], index: 6, kind: input, shape index: {}]   ;;  %s1114_s7 = inlined_call_operand.hbm [shape: f32[1,1,128], index: 7, kind: output, shape index: {}]  }
   0x1   :  { %14 = vsyncpa [#allocation7], 0 }
   0x2   :  { %15 = vsyncpa [#allocation5], 0 }
   0x3   :  { %20 = vsyncadd [#allocation4], 1920  ;;  %s957_s24 = smov [#allocation6]   ;;  %s958_s26 = smov [#allocation3]  }
   0x4   :  { %s33_s25 = sshll.u32 %s957_s24, 4  ;;  %s21_s27 = sshll.u32 %s958_s26, 4  ;;  %s34_s25 = int_to_ptr.vmem [resolvable:$true] %s33_s25  ;;  %s1006_s27 = int_to_ptr.vmem [resolvable:$true] %s21_s27 }
   0x5   :  { %s863_s30 = scalar_lea.hbm %s1108_s1, 512 }
   0x6   :  { %p864_p0 = scmp.ne.s32.totalorder %s1108_s1, %s863_s30  ;;  %p867_p1 = scmp.lt.u32.totalorder %s863_s30, %s1108_s1 }
   0x8   :  { %p869_p2 = pnand %p867_p1, %p864_p0 }
   0xa   :  { %872 = shalt.err (!%p869_p2)
}
   0xb   :  { %s873_s12 = scalar_lea.vmem %s34_s25, 512  ;;  %p878_p4 = scmp.lt.s32.totalorder %s34_s25, %s34_s25 }
   0xc   :  { %p874_p3 = scmp.ne.s32.totalorder %s34_s25, %s873_s12  ;;  %p879_p5 = scmp.lt.s32.totalorder %s873_s12, %s873_s12 }
   0xe   :  { %p880_p6 = por %p879_p5, %p878_p4 }
  0x10   :  { %p881_p7 = pnand %p880_p6, %p874_p3 }
  0x12   :  { %884 = shalt.err (!%p881_p7)
}
  0x13   :  { %s959_s13 = smov 128   ;;  %s960_s14 = smov 8  }
  0x14   :  { %39 = dma.hbm_to_vmem [thread:$0]  %s1108_s1, 512, %s34_s25, [#allocation7], %s959_s13, %s959_s13, %s960_s14  }
  0x15   :  { %s885_s19 = scalar_lea.hbm %s1107_s0, 128 }
  0x16   :  { %p886_p8 = scmp.ne.s32.totalorder %s1107_s0, %s885_s19  ;;  %p889_p9 = scmp.lt.u32.totalorder %s885_s19, %s1107_s0 }
  0x18   :  { %p891_p10 = pnand %p889_p9, %p886_p8 }
  0x1a   :  { %894 = shalt.err (!%p891_p10)
}
  0x1b   :  { %s895_s24 = scalar_lea.vmem %s1006_s27, 128  ;;  %s899_s1 = scalar_lea.vmem %s1006_s27, 2048 }
  0x1c   :  { %p896_p11 = scmp.ne.s32.totalorder %s1006_s27, %s895_s24  ;;  %p900_p12 = scmp.lt.s32.totalorder %s1006_s27, %s1006_s27 }
  0x1d   :  { %p901_p13 = scmp.lt.s32.totalorder %s899_s1, %s895_s24 }
  0x1f   :  { %p902_p0 = por %p901_p13, %p900_p12 }
  0x21   :  { %p903_p1 = pnand %p902_p0, %p896_p11 }
  0x23   :  { %906 = shalt.err (!%p903_p1)
}
  0x24   :  { %27 = dma.hbm_to_vmem [thread:$0]  %s1107_s0, 128, %s1006_s27, [#allocation4], %s959_s13, %s959_s13, %s960_s14  }
  0x25   :  { %s961_s28 = smov [#allocation8]   ;;  %s907_s9 = scalar_lea.hbm %s1110_s3, 2048 }
  0x26   :  { %s47_s29 = sshll.u32 %s961_s28, 4  ;;  %p908_p2 = scmp.ne.s32.totalorder %s1110_s3, %s907_s9  ;;  %s48_s29 = int_to_ptr.vmem [resolvable:$true] %s47_s29 }
  0x27   :  { %p911_p3 = scmp.lt.u32.totalorder %s907_s9, %s1110_s3 }
  0x29   :  { %p913_p4 = pnand %p911_p3, %p908_p2 }
  0x2b   :  { %916 = shalt.err (!%p913_p4)
}
  0x2c   :  { %s917_s16 = scalar_lea.vmem %s48_s29, 2048  ;;  %p922_p6 = scmp.lt.s32.totalorder %s48_s29, %s48_s29 }
  0x2d   :  { %p918_p5 = scmp.ne.s32.totalorder %s48_s29, %s917_s16  ;;  %p923_p7 = scmp.lt.s32.totalorder %s917_s16, %s917_s16 }
  0x2f   :  { %p924_p8 = por %p923_p7, %p922_p6 }
  0x31   :  { %p925_p9 = pnand %p924_p8, %p918_p5 }
  0x33   :  { %928 = shalt.err (!%p925_p9)
}
  0x34   :  { %53 = dma.hbm_to_vmem [thread:$0]  %s1110_s3, 2048, %s48_s29, [#allocation7], %s959_s13, %s959_s13, %s960_s14  }
  0x35   :  { %951 = dma.done.wait [#allocation4], 2048  }
  0x36   :  { %952 = vsyncadd [#allocation4], 4294965248 }
  0x37   :  { %953 = dma.done.wait [#allocation7], 2560  }
  0x38   :  { %954 = vsyncadd [#allocation7], 4294964736  ;;  %vm96_vm0 = vcmask 261120   ;;  %v85_v0 = vld [vmem:[#allocation6] sm:$0xff]  ;;  %v86_v1 = vld [vmem:[#allocation6 + $0x8] sm:$0xff]  ;;  %vm963_vm1 = vmmov 0  }
  0x39   :  { %v87_v2 = vld [vmem:[#allocation6 + $0x10] sm:$0xff]  ;;  %v790_v3 = vpack.c.bf16 %v86_v1, %v85_v0  ;;  %v88_v4 = vld [vmem:[#allocation6 + $0x18] sm:$0xff]  ;;  %v69_v5 = vld [vmem:[#allocation3] sm:$0xff]  ;;  %s965_s20 = smov [#allocation9]  }
  0x3a   :  { %v794_v6 = vpack.c.bf16 %v88_v4, %v87_v2  ;;  %675 = vmatprep.mubr.msk.f32.mxu1 %vm96_vm0, %v69_v5  ;;  %v306_v7 = vld [vmem:[#allocation8] sm:$0xff]  ;;  %v307_v8 = vld [vmem:[#allocation8 + $0x8] sm:$0xff]  ;;  %v308_v9 = vld [vmem:[#allocation8 + $0x10] sm:$0xff]  ;;  %s570_s21 = sshll.u32 %s965_s20, 4  ;;  %s571_s21 = int_to_ptr.vmem [resolvable:$true] %s570_s21 }
  0x3b   :  { %791 = vmatprep.subr.bf16.mxu1 %v790_v3  ;;  %v309_v10 = vld [vmem:[#allocation8 + $0x18] sm:$0xff]  ;;  %v70_v11 = vld [vmem:[#allocation3 + $0x8] sm:$0xff]  ;;  %v798_v12 = vpack.c.bf16 %v307_v8, %v306_v7  ;;  %v71_v13 = vld [vmem:[#allocation3 + $0x10] sm:$0xff]  ;;  %s929_s22 = scalar_lea.vmem %s571_s21, 16  ;;  %s933_s23 = scalar_lea.vmem %s571_s21, 32 }
  0x3c   :  { %793 = vmatpush3.bf16.msra.mxu1 %v790_v3  ;;  %v802_v14 = vpack.c.bf16 %v309_v10, %v308_v9  ;;  %v310_v15 = vld [vmem:[#allocation8 + $0x20] sm:$0xff]  ;;  %v311_v16 = vld [vmem:[#allocation8 + $0x28] sm:$0xff]  ;;  %v72_v17 = vld [vmem:[#allocation3 + $0x18] sm:$0xff]  ;;  %p930_p10 = scmp.ne.s32.totalorder %s571_s21, %s929_s22  ;;  %p934_p11 = scmp.lt.s32.totalorder %s571_s21, %s571_s21 }
  0x3d   :  { %795 = vmatprep.subr.bf16.mxu1 %v794_v6  ;;  %v73_v18 = vld [vmem:[#allocation3 + $0x20] sm:$0xff]  ;;  %v806_v19 = vpack.c.bf16 %v311_v16, %v310_v15  ;;  %v312_v20 = vld [vmem:[#allocation8 + $0x30] sm:$0xff]  ;;  %v313_v21 = vld [vmem:[#allocation8 + $0x38] sm:$0xff]  ;;  %p935_p12 = scmp.lt.s32.totalorder %s933_s23, %s929_s22 }
  0x3e   :  { %v74_v22 = vld [vmem:[#allocation3 + $0x28] sm:$0xff]  ;;  %v75_v23 = vld [vmem:[#allocation3 + $0x30] sm:$0xff]  ;;  %v810_v24 = vpack.c.bf16 %v313_v21, %v312_v20  ;;  %v314_v25 = vld [vmem:[#allocation8 + $0x40] sm:$0xff] }
  0x3f   :  { %v315_v26 = vld [vmem:[#allocation8 + $0x48] sm:$0xff]  ;;  %v76_v27 = vld [vmem:[#allocation3 + $0x38] sm:$0xff]  ;;  %v77_v28 = vld [vmem:[#allocation3 + $0x40] sm:$0xff]  ;;  %p936_p13 = por %p935_p12, %p934_p11 }
  0x40   :  { %797 = vmatpush3.bf16.msra.mxu1 %v794_v6  ;;  %v814_v29 = vpack.c.bf16 %v315_v26, %v314_v25  ;;  %v316_v30 = vld [vmem:[#allocation8 + $0x50] sm:$0xff]  ;;  %v317_v31 = vld [vmem:[#allocation8 + $0x58] sm:$0xff]  ;;  %v78_v32 = vld [vmem:[#allocation3 + $0x48] sm:$0xff] }
  0x41   :  { %799 = vmatprep.subr.bf16.mxu1 %v798_v12  ;;  %v79_v33 = vld [vmem:[#allocation3 + $0x50] sm:$0xff]  ;;  %v818_v34 = vpack.c.bf16 %v317_v31, %v316_v30  ;;  %v318_v35 = vld [vmem:[#allocation8 + $0x60] sm:$0xff]  ;;  %v319_v36 = vld [vmem:[#allocation8 + $0x68] sm:$0xff]  ;;  %v962_v31 = vmov 0.0|0.0   ;;  %p937_p0 = pnand %p936_p13, %p930_p10 }
  0x42   :  { %v80_v37 = vld [vmem:[#allocation3 + $0x58] sm:$0xff]  ;;  %v81_v38 = vld [vmem:[#allocation3 + $0x60] sm:$0xff]  ;;  %v822_v39 = vpack.c.bf16 %v319_v36, %v318_v35  ;;  %v82_v40 = vld [vmem:[#allocation3 + $0x68] sm:$0xff]  ;;  %830 = vmatprep.subr.bf16.mxu0 %v962_v31 }
  0x43   :  { %676 = vmatmul.mubr.msk.f32.vlgmr.msra.gmra.mrb[0].mxu1 %vm96_vm0, %v70_v11  ;;  %v83_v41 = vld [vmem:[#allocation3 + $0x70] sm:$0xff]  ;;  %v84_v42 = vld [vmem:[#allocation3 + $0x78] sm:$0xff]  ;;  %v580_v46 = vld [vmem:[%s1109_s2] ss:$0 sm:$0xff] }
  0x44   :  { %678 = vmatprep.mubr.msk.f32.mxu1 %vm96_vm0, %v71_v13  ;;  %801 = vmatpush3.bf16.msra.mxu1 %v798_v12  ;;  %v320_v43 = vld [vmem:[#allocation8 + $0x70] sm:$0xff]  ;;  %v321_v44 = vld [vmem:[#allocation8 + $0x78] sm:$0xff] }
  0x45   :  { %803 = vmatprep.subr.bf16.mxu1 %v802_v14  ;;  %v826_v45 = vpack.c.bf16 %v321_v44, %v320_v43 }
  0x47   :  { %679 = vmatmul.mubr.msk.f32.gmra.mrb[2].mxu1 %vm96_vm0, %v72_v17 }
  0x48   :  { %681 = vmatprep.mubr.msk.f32.mxu1 %vm96_vm0, %v73_v18  ;;  %805 = vmatpush3.bf16.msra.mxu1 %v802_v14 }
  0x49   :  { %807 = vmatprep.subr.bf16.mxu1 %v806_v19 }
  0x4b   :  { %682 = vmatmul.mubr.msk.f32.gmra.mrb[4].mxu1 %vm96_vm0, %v74_v22 }
  0x4c   :  { %684 = vmatprep.mubr.msk.f32.mxu1 %vm96_vm0, %v75_v23  ;;  %809 = vmatpush3.bf16.msra.mxu1 %v806_v19 }
  0x4d   :  { %811 = vmatprep.subr.bf16.mxu1 %v810_v24 }
  0x4f   :  { %685 = vmatmul.mubr.msk.f32.gmra.mrb[6].mxu1 %vm96_vm0, %v76_v27 }
  0x50   :  { %687 = vmatprep.mubr.msk.f32.mxu1 %vm96_vm0, %v77_v28  ;;  %813 = vmatpush3.bf16.msra.mxu1 %v810_v24 }
  0x51   :  { %815 = vmatprep.subr.bf16.mxu1 %v814_v29 }
  0x53   :  { %688 = vmatmul.mubr.msk.f32.gmra.mrb[8].mxu1 %vm96_vm0, %v78_v32  ;;  %v964_v32 = vmov 0.0  }
  0x54   :  { %690 = vmatprep.mubr.msk.f32.mxu1 %vm96_vm0, %v79_v33  ;;  %817 = vmatpush3.bf16.msra.mxu1 %v814_v29  ;;  %v597_v33 = vld [vmem:[%s1111_s4] ss:$0 sm:$0xff] }
  0x55   :  { %819 = vmatprep.subr.bf16.mxu1 %v818_v34  ;;  %787 = vmatprep.mubr.msk.f32.mxu0 %vm963_vm1, %v964_v32 }
  0x57   :  { %691 = vmatmul.mubr.msk.f32.gmra.mrb[10].mxu1 %vm96_vm0, %v80_v37 }
  0x58   :  { %693 = vmatprep.mubr.msk.f32.mxu1 %vm96_vm0, %v81_v38  ;;  %821 = vmatpush3.bf16.msra.mxu1 %v818_v34 }
  0x59   :  { %823 = vmatprep.subr.bf16.mxu1 %v822_v39 }
  0x5b   :  { %694 = vmatmul.mubr.msk.f32.gmra.mrb[12].mxu1 %vm96_vm0, %v82_v40 }
  0x5c   :  { %696 = vmatprep.mubr.msk.f32.mxu1 %vm96_vm0, %v83_v41  ;;  %825 = vmatpush3.bf16.msra.mxu1 %v822_v39 }
  0x5d   :  { %827 = vmatprep.subr.bf16.mxu1 %v826_v45 }
  0x5f   :  { %697 = vmatmul.mubr.msk.f32.gmra.mrb[14].mxu1 %vm96_vm0, %v84_v42 }
  0x60   :  { %829 = vmatpush3.bf16.msra.mxu1 %v826_v45 }
 0x116   :  { %v677_v47 = vpop.f32.mrb[0].mxu1 }
 0x117   :  { %v217_v48 = vadd.f32 %v677_v47, %v580_v46  ;;  %v211_v49 = vpop.f32.mrb[1].mxu1 }
 0x118   :  { %v212_v50 = vadd.f32 %v580_v46, %v211_v49 }
 0x119   :  { %v291_v53 = vmax.f32 %v217_v48, 0.0 }
 0x11a   :  { %v290_v51 = vmax.f32 %v212_v50, 0.0  ;;  %v680_v52 = vpop.f32.mrb[2].mxu1 }
 0x11b   :  { %v227_v54 = vadd.f32 %v680_v52, %v580_v46  ;;  %v221_v55 = vpop.f32.mrb[3].mxu1 }
 0x11c   :  { %v222_v56 = vadd.f32 %v580_v46, %v221_v55  ;;  %731 = vmatprep.mubr.f32.mxu1 %v290_v51 }
 0x11d   :  { %v293_v57 = vmax.f32 %v227_v54, 0.0  ;;  %732 = vmatmul.mubr.f32.vlgmr.msra.gmra.mrb[16].mxu1 %v291_v53 }
 0x11e   :  { %v292_v58 = vmax.f32 %v222_v56, 0.0  ;;  %v683_v59 = vpop.f32.mrb[4].mxu1 }
 0x11f   :  { %v237_v60 = vadd.f32 %v683_v59, %v580_v46  ;;  %v231_v61 = vpop.f32.mrb[5].mxu1 }
 0x120   :  { %734 = vmatprep.mubr.f32.mxu1 %v292_v58  ;;  %v232_v62 = vadd.f32 %v580_v46, %v231_v61 }
 0x121   :  { %735 = vmatmul.mubr.f32.gmra.mrb[18].mxu1 %v293_v57  ;;  %v295_v63 = vmax.f32 %v237_v60, 0.0 }
 0x122   :  { %v294_v0 = vmax.f32 %v232_v62, 0.0  ;;  %v686_v1 = vpop.f32.mrb[6].mxu1 }
 0x123   :  { %v247_v2 = vadd.f32 %v686_v1, %v580_v46  ;;  %v241_v3 = vpop.f32.mrb[7].mxu1 }
 0x124   :  { %737 = vmatprep.mubr.f32.mxu1 %v294_v0  ;;  %v242_v4 = vadd.f32 %v580_v46, %v241_v3 }
 0x125   :  { %738 = vmatmul.mubr.f32.gmra.mrb[20].mxu1 %v295_v63  ;;  %v297_v5 = vmax.f32 %v247_v2, 0.0 }
 0x126   :  { %v296_v6 = vmax.f32 %v242_v4, 0.0  ;;  %v689_v7 = vpop.f32.mrb[8].mxu1 }
 0x127   :  { %v257_v8 = vadd.f32 %v689_v7, %v580_v46  ;;  %v251_v9 = vpop.f32.mrb[9].mxu1 }
 0x128   :  { %740 = vmatprep.mubr.f32.mxu1 %v296_v6  ;;  %v252_v10 = vadd.f32 %v580_v46, %v251_v9 }
 0x129   :  { %741 = vmatmul.mubr.f32.gmra.mrb[22].mxu1 %v297_v5  ;;  %v299_v11 = vmax.f32 %v257_v8, 0.0 }
 0x12a   :  { %v298_v12 = vmax.f32 %v252_v10, 0.0  ;;  %v692_v13 = vpop.f32.mrb[10].mxu1 }
 0x12b   :  { %v267_v14 = vadd.f32 %v692_v13, %v580_v46  ;;  %v261_v15 = vpop.f32.mrb[11].mxu1 }
 0x12c   :  { %743 = vmatprep.mubr.f32.mxu1 %v298_v12  ;;  %v262_v16 = vadd.f32 %v580_v46, %v261_v15 }
 0x12d   :  { %744 = vmatmul.mubr.f32.gmra.mrb[24].mxu1 %v299_v11  ;;  %v301_v17 = vmax.f32 %v267_v14, 0.0 }
 0x12e   :  { %v300_v18 = vmax.f32 %v262_v16, 0.0  ;;  %v695_v19 = vpop.f32.mrb[12].mxu1 }
 0x12f   :  { %v277_v20 = vadd.f32 %v695_v19, %v580_v46  ;;  %v271_v21 = vpop.f32.mrb[13].mxu1 }
 0x130   :  { %746 = vmatprep.mubr.f32.mxu1 %v300_v18  ;;  %v272_v22 = vadd.f32 %v580_v46, %v271_v21 }
 0x131   :  { %747 = vmatmul.mubr.f32.gmra.mrb[26].mxu1 %v301_v17  ;;  %v303_v23 = vmax.f32 %v277_v20, 0.0 }
 0x132   :  { %v302_v24 = vmax.f32 %v272_v22, 0.0  ;;  %v698_v25 = vpop.f32.mrb[14].mxu1 }
 0x133   :  { %v287_v26 = vadd.f32 %v698_v25, %v580_v46  ;;  %v281_v27 = vpop.f32.mrb[15].mxu1 }
 0x134   :  { %749 = vmatprep.mubr.f32.mxu1 %v302_v24  ;;  %v282_v28 = vadd.f32 %v580_v46, %v281_v27  ;;  %v492_v27 = vstv %s1113_s6 }
 0x135   :  { %750 = vmatmul.mubr.f32.gmra.mrb[28].mxu1 %v303_v23  ;;  %v305_v29 = vmax.f32 %v287_v26, 0.0  ;;  %v490_v26 = vld [vmem:[%s1112_s5] sm:$0x1] }
 0x136   :  { %v304_v30 = vmax.f32 %v282_v28, 0.0 }
 0x138   :  { %752 = vmatprep.mubr.f32.mxu1 %v304_v30 }
 0x139   :  { %753 = vmatmul.mubr.f32.gmra.mrb[30].mxu1 %v305_v29 }
 0x1f0   :  { %v733_v34 = vpop.f32.mrb[16].mxu1 }
 0x1f1   :  { %v401_v35 = vadd.f32 %v733_v34, %v597_v33  ;;  %v395_v36 = vpop.f32.mrb[17].mxu1 }
 0x1f2   :  { %v396_v37 = vadd.f32 %v597_v33, %v395_v36 }
 0x1f3   :  { %v475_v38 = vmax.f32 %v401_v35, 0.0 }
 0x1f4   :  { %v474_v39 = vmax.f32 %v396_v37, 0.0  ;;  %v736_v40 = vpop.f32.mrb[18].mxu1 }
 0x1f5   :  { %v411_v41 = vadd.f32 %v736_v40, %v597_v33  ;;  %v405_v42 = vpop.f32.mrb[19].mxu1 }
 0x1f6   :  { %v406_v43 = vadd.f32 %v597_v33, %v405_v42  ;;  %v831_v44 = vpack.c.bf16 %v475_v38, %v474_v39 }
 0x1f7   :  { %v477_v45 = vmax.f32 %v411_v41, 0.0 }
 0x1f8   :  { %v476_v46 = vmax.f32 %v406_v43, 0.0  ;;  %832 = vmatpush3.bf16.xpose.msra.mxu0 %v831_v44  ;;  %v739_v47 = vpop.f32.mrb[20].mxu1 }
 0x1f9   :  { %v421_v48 = vadd.f32 %v739_v47, %v597_v33  ;;  %v415_v49 = vpop.f32.mrb[21].mxu1  ;;  %833 = vmatprep.subr.bf16.mxu0 %v962_v31 }
 0x1fa   :  { %v834_v50 = vpack.c.bf16 %v477_v45, %v476_v46  ;;  %v416_v51 = vadd.f32 %v597_v33, %v415_v49 }
 0x1fb   :  { %v479_v52 = vmax.f32 %v421_v48, 0.0 }
 0x1fc   :  { %v478_v53 = vmax.f32 %v416_v51, 0.0  ;;  %v742_v54 = vpop.f32.mrb[22].mxu1 }
 0x1fd   :  { %v431_v55 = vadd.f32 %v742_v54, %v597_v33  ;;  %v425_v56 = vpop.f32.mrb[23].mxu1 }
 0x1fe   :  { %v837_v57 = vpack.c.bf16 %v479_v52, %v478_v53  ;;  %v426_v58 = vadd.f32 %v597_v33, %v425_v56 }
 0x1ff   :  { %v481_v59 = vmax.f32 %v431_v55, 0.0 }
 0x200   :  { %835 = vmatpush3.bf16.xpose.msra.mxu0 %v834_v50  ;;  %v480_v60 = vmax.f32 %v426_v58, 0.0  ;;  %v745_v61 = vpop.f32.mrb[24].mxu1 }
 0x201   :  { %836 = vmatprep.subr.bf16.mxu0 %v962_v31  ;;  %v441_v62 = vadd.f32 %v745_v61, %v597_v33  ;;  %v435_v63 = vpop.f32.mrb[25].mxu1 }
 0x202   :  { %v840_v0 = vpack.c.bf16 %v481_v59, %v480_v60  ;;  %v436_v1 = vadd.f32 %v597_v33, %v435_v63 }
 0x203   :  { %v483_v2 = vmax.f32 %v441_v62, 0.0 }
 0x204   :  { %v482_v3 = vmax.f32 %v436_v1, 0.0  ;;  %v748_v4 = vpop.f32.mrb[26].mxu1 }
 0x205   :  { %v451_v5 = vadd.f32 %v748_v4, %v597_v33  ;;  %v445_v6 = vpop.f32.mrb[27].mxu1 }
 0x206   :  { %v843_v7 = vpack.c.bf16 %v483_v2, %v482_v3  ;;  %v446_v8 = vadd.f32 %v597_v33, %v445_v6 }
 0x207   :  { %v485_v9 = vmax.f32 %v451_v5, 0.0 }
 0x208   :  { %838 = vmatpush3.bf16.xpose.msra.mxu0 %v837_v57  ;;  %v484_v10 = vmax.f32 %v446_v8, 0.0  ;;  %v751_v11 = vpop.f32.mrb[28].mxu1 }
 0x209   :  { %839 = vmatprep.subr.bf16.mxu0 %v962_v31  ;;  %v461_v12 = vadd.f32 %v751_v11, %v597_v33  ;;  %v455_v13 = vpop.f32.mrb[29].mxu1 }
 0x20a   :  { %v846_v14 = vpack.c.bf16 %v485_v9, %v484_v10  ;;  %v456_v15 = vadd.f32 %v597_v33, %v455_v13 }
 0x20b   :  { %v487_v16 = vmax.f32 %v461_v12, 0.0 }
 0x20c   :  { %v486_v17 = vmax.f32 %v456_v15, 0.0  ;;  %v754_v18 = vpop.f32.mrb[30].mxu1 }
 0x20d   :  { %v471_v19 = vadd.f32 %v754_v18, %v597_v33  ;;  %v465_v20 = vpop.f32.mrb[31].mxu1 }
 0x20e   :  { %v849_v21 = vpack.c.bf16 %v487_v16, %v486_v17  ;;  %v466_v22 = vadd.f32 %v597_v33, %v465_v20 }
 0x20f   :  { %v489_v23 = vmax.f32 %v471_v19, 0.0 }
 0x210   :  { %841 = vmatpush3.bf16.xpose.msra.mxu0 %v840_v0  ;;  %v488_v24 = vmax.f32 %v466_v22, 0.0 }
 0x211   :  { %842 = vmatprep.subr.bf16.mxu0 %v962_v31 }
 0x212   :  { %v852_v25 = vpack.c.bf16 %v489_v23, %v488_v24 }
 0x218   :  { %844 = vmatpush3.bf16.xpose.msra.mxu0 %v843_v7 }
 0x219   :  { %845 = vmatprep.subr.bf16.mxu0 %v962_v31 }
 0x220   :  { %847 = vmatpush3.bf16.xpose.msra.mxu0 %v846_v14 }
 0x221   :  { %848 = vmatprep.subr.bf16.mxu0 %v962_v31 }
 0x228   :  { %850 = vmatpush3.bf16.xpose.msra.mxu0 %v849_v21 }
 0x229   :  { %851 = vmatprep.subr.bf16.mxu0 %v962_v31 }
 0x230   :  { %853 = vmatpush3.bf16.xpose.msra.mxu0 %v852_v25 }
 0x237   :  { %788 = vmatmul.mubr.f32.vlgmr.msra.gmra.mrb[0].mxu0 %v490_v26 }
 0x30a   :  { %v559_v28 = vpop.f32.mrb[0].mxu0 }
 0x30b   :  { %v560_v29 = vadd.f32 %v559_v28, %v492_v27  ;;  %v789_v30 = vpop.f32.mrb[1].mxu0 }
 0x30d   :  { %563 = vst [vmem:[#allocation9] sm:$0x1] %v560_v29 }
 0x30e   :  { %940 = shalt.err (!%p937_p0)
}
 0x30f   :  { %s941_s1 = scalar_lea.hbm %s1114_s7, 16 }
 0x310   :  { %p942_p1 = scmp.ne.s32.totalorder %s1114_s7, %s941_s1  ;;  %p945_p2 = scmp.lt.u32.totalorder %s941_s1, %s1114_s7 }
 0x312   :  { %p947_p3 = pnand %p945_p2, %p942_p1 }
 0x314   :  { %950 = shalt.err (!%p947_p3)
}
 0x315   :  { %573 = dma.vmem_to_hbm [thread:$0]  %s571_s21, 16, %s1114_s7, [#allocation5]  }
 0x316   :  { %955 = dma.done.wait [#allocation5], 16  }
 0x317   :  { %956 = vsyncadd [#allocation5], 4294967280 }
 0x318   :  { %577 = vsyncpa [#allocation4], 1 }
 0x319   :  { %578 = vsyncpa [#allocation7], 1 }
 0x31a   :  { %579 = vsyncpa [#allocation5], 1 }

</bundles_post_ra>
